<compile_context>
chip_gen: v5e
topology: v5e:2x2
jax: 0.10.0
libtpu: 0.0.40
codegen_flags: <defaults>
</compile_context>

<pallas_src>
import functools

import jax
import jax.numpy as jnp
from jax import lax
from jax.experimental import pallas as pl
from jax.experimental.pallas import tpu as pltpu


def _round_up(x, m):
    return ((x + m - 1) // m) * m


# ----------------------------- Pallas kernel --------------------------------
def _acnh_fused_kernel(*refs, emb_offsets, num_hidden):
    """One batch tile of the fused forward.

    refs = (x_feats[TB, n_cat] int32,
            W_1..W_{num_hidden+1} (bf16, BN & embeddings pre-folded, zero-padded),
            bias_pack [num_hidden+1, P] f32,
            out [TB, P] f32)
    """
    xf_ref = refs[0]
    w_refs = refs[1:2 + num_hidden]
    b_ref = refs[2 + num_hidden]
    out_ref = refs[3 + num_hidden]

    TB = xf_ref.shape[0]
    NOH = w_refs[0].shape[0]                      # padded one-hot width (mult of 128)

    idx = xf_ref[...]                             # [TB, n_cat] int32
    col = lax.broadcasted_iota(jnp.int32, (TB, NOH), 1)

    # Concatenated one-hot encoding of all categorical features (disjoint column
    # ranges, so the sum of per-feature one-hots equals the concatenation).
    onehot = jnp.zeros((TB, NOH), jnp.float32)
    for i, off in enumerate(emb_offsets):         # static Python loop (few features)
        onehot += (col == (idx[:, i:i + 1] + off)).astype(jnp.float32)

    b = b_ref[...]                                # [L+1, P] f32
    h = onehot.astype(jnp.bfloat16)               # exact (0/1 values)

    # Hidden layers: Linear (-> already-folded BN of previous layer) -> ReLU.
    for l in range(num_hidden):
        h = jnp.dot(h, w_refs[l][...], preferred_element_type=jnp.float32)
        h = jnp.maximum(h + b[l:l + 1, :], 0.0).astype(jnp.bfloat16)

    # Output head (last BN folded into these weights). Lane-dense f32 store.
    out_ref[...] = (jnp.dot(h, w_refs[num_hidden][...],
                            preferred_element_type=jnp.float32)
                    + b[num_hidden:num_hidden + 1, :])


# ------------------------------- wrapper -------------------------------------
def acnh_forward_pallas(x_feats, fused, *, block_b=128):
    """x_feats: [B, n_cat] int32 categorical indices. Returns [B, out_features] f32."""
    ws = fused["ws"]
    bias = fused["bias"]
    num_hidden = fused["num_hidden"]
    out_features = fused["out_features"]
    emb_offsets = fused["emb_offsets"]

    B, n_cat = x_feats.shape
    TB = block_b
    assert TB % 8 == 0, "batch tile must be a multiple of 8 (sublane)"
    B_pad = _round_up(B, TB)
    if B_pad != B:
        x_feats = jnp.pad(x_feats, ((0, B_pad - B), (0, 0)))   # index 0 is always valid

    OUTP = ws[-1].shape[1]
    grid = (B_pad // TB,)

    kernel = functools.partial(_acnh_fused_kernel,
                               emb_offsets=emb_offsets,
                               num_hidden=num_hidden)

    in_specs = [pl.BlockSpec((TB, n_cat), lambda i: (i, 0))]   # batch-tiled indices
    for W in ws:                                               # resident weights
        in_specs.append(pl.BlockSpec(W.shape, lambda i: (0, 0)))
    in_specs.append(pl.BlockSpec(bias.shape, lambda i: (0, 0)))  # packed biases

    # Explicit scoped-VMEM budget: tiles are double-buffered, weights resident,
    # plus generous headroom for compiler-internal scratch. Portable across
    # v5e/v6e (128 MiB) and v7x (64 MiB) physical VMEM.
    w_bytes = sum(2 * W.size * W.dtype.itemsize for W in ws)
    vmem_bytes = (2 * TB * n_cat * 4            # x_feats tiles
                  + 2 * TB * OUTP * 4           # output tiles
                  + w_bytes                     # bf16 weights (double-buffer slot)
                  + 2 * bias.size * 4           # packed biases
                  + (8 << 20))                  # headroom

    out = pl.pallas_call(
        kernel,
        out_shape=jax.ShapeDtypeStruct((B_pad, OUTP), jnp.float32),
        grid=grid,
        in_specs=in_specs,
        out_specs=pl.BlockSpec((TB, OUTP), lambda i: (i, 0)),
        compiler_params=pltpu.CompilerParams(
            dimension_semantics=("parallel",),      # batch tiles shard across TCs (v7x)
            vmem_limit_bytes=int(vmem_bytes)),
    )(x_feats, *ws, bias)

    return out[:B, :out_features]


# ------------------------- parameter construction ---------------------------
def init_raw_params(key, emb_sizes, layers, out_features):
    """Deterministic synthetic parameters matching the PyTorch module shapes."""
    keys = jax.random.split(key, 32)
    kit = iter(keys)

    emb_tables = [jax.random.normal(next(kit), (ni, nf), jnp.float32) * 0.1
                  for ni, nf in emb_sizes]
    n_in = sum(nf for _, nf in emb_sizes)

    def linear(k, fan_in, fan_out):
        kw, kb = jax.random.split(k)
        w = jax.random.normal(kw, (fan_in, fan_out), jnp.float32) * 0.1
        b = jax.random.normal(kb, (fan_out,), jnp.float32) * 0.1
        return w, b

    def bn(k, units):
        kg, kb, km, kv = jax.random.split(k, 4)
        gamma = 1.0 + 0.1 * jax.random.normal(kg, (units,), jnp.float32)
        beta = 0.1 * jax.random.normal(kb, (units,), jnp.float32)
        mean = 0.1 * jax.random.normal(km, (units,), jnp.float32)
        var = jnp.abs(1.0 + 0.1 * jax.random.normal(kv, (units,), jnp.float32))
        return gamma, beta, mean, var

    linears, bns = [], []
    fan_in = n_in
    for units in layers:
        linears.append(linear(next(kit), fan_in, units))
        bns.append(bn(next(kit), units))
        fan_in = units
    head = linear(next(kit), fan_in, out_features)

    return dict(emb_tables=emb_tables, linears=linears, bns=bns, head=head)


def fold_params(raw, emb_sizes, layers, out_features, eps=1e-5):
    """Fold embeddings into W1 and each BN into the following linear; pad to 128."""
    n_onehot = sum(ni for ni, _ in emb_sizes)
    n_in = sum(nf for _, nf in emb_sizes)

    # Block-diagonal embedding matrix E: onehot_all @ E == concat(embeddings).
    E = jnp.zeros((n_onehot, n_in), jnp.float32)
    ro, co = 0, 0
    for tbl, (ni, nf) in zip(raw["emb_tables"], emb_sizes):
        E = E.at[ro:ro + ni, co:co + nf].set(tbl)
        ro += ni
        co += nf

    # (s*relu(z) + t) @ W + b  ==  relu(z) @ (diag(s) W) + (t W + b)
    Ws, bs = [], []
    w0, b0 = raw["linears"][0]
    W_cur, b_cur = E @ w0, b0                       # embeddings folded into linear 1
    for l in range(len(layers)):
        gamma, beta, mean, var = raw["bns"][l]
        s = gamma / jnp.sqrt(var + eps)
        t = beta - mean * s
        Ws.append(W_cur)
        bs.append(b_cur)
        w_next, b_next = (raw["linears"][l + 1] if l + 1 < len(layers)
                          else raw["head"])
        W_cur = s[:, None] * w_next
        b_cur = t @ w_next + b_next
    Ws.append(W_cur)                                # head with last BN folded in
    bs.append(b_cur)

    # Pad everything to a common lane-dense width (multiple of 128); zero padding
    # keeps the math exact (relu(0)=0 and zero weight rows/cols contribute nothing).
    NOH_PAD = _round_up(n_onehot, 128)
    P = max(_round_up(u, 128) for u in list(layers) + [out_features])

    in_pads = [NOH_PAD] + [P] * len(layers)
    padded_ws = []
    for W, ip in zip(Ws, in_pads):
        pw = jnp.zeros((ip, P), jnp.float32).at[:W.shape[0], :W.shape[1]].set(W)
        padded_ws.append(pw.astype(jnp.bfloat16))

    bias = jnp.zeros((len(bs), P), jnp.float32)
    for l, bvec in enumerate(bs):
        bias = bias.at[l, :bvec.shape[0]].set(bvec)

    emb_offsets, off = [], 0
    for ni, _ in emb_sizes:
        emb_offsets.append(off)
        off += ni

    return dict(ws=tuple(padded_ws), bias=bias, emb_offsets=tuple(emb_offsets),
                out_features=out_features, num_hidden=len(layers))


# ------------------------------ reference ------------------------------------
def acnh_forward_ref(x_feats, raw, layers, eps=1e-5):
    """Unfused f32 reference matching the PyTorch module in eval mode."""
    embs = [jnp.take(tbl, x_feats[:, i], axis=0)
            for i, tbl in enumerate(raw["emb_tables"])]
    h = jnp.concatenate(embs, axis=1)
    for l in range(len(layers)):
        w, b = raw["linears"][l]
        gamma, beta, mean, var = raw["bns"][l]
        h = jnp.maximum(h @ w + b, 0.0)
        h = (h - mean) / jnp.sqrt(var + eps) * gamma + beta
    w, b = raw["head"]
    return h @ w + b


# --------------------------------- main ---------------------------------------
if __name__ == "__main__":
    # Small shapes consistent with the module.
    emb_sizes = [(10, 4), (8, 4), (6, 8)]      # 3 categorical features, n_in = 16
    layers = [32, 16]
    out_features = 4
    batch = 8

    key = jax.random.PRNGKey(0)
    k_params, k_data = jax.random.split(key)
    raw = init_raw_params(k_params, emb_sizes, layers, out_features)
    fused = fold_params(raw, emb_sizes, layers, out_features)

    # Categorical input indices x_feats: [batch, n_cat] int32
    maxes = jnp.array([ni for ni, _ in emb_sizes], dtype=jnp.int32)
    x_feats = (jax.random.randint(k_data, (batch, len(emb_sizes)), 0, 1 << 16)
               % maxes).astype(jnp.int32)

    out = acnh_forward_pallas(x_feats, fused, block_b=128)
    out = jax.block_until_ready(out)

    ref = acnh_forward_ref(x_feats, raw, layers)
    assert out.shape == (batch, out_features), out.shape
    max_err = float(jnp.max(jnp.abs(out - ref)))
    # bf16 MXU path -> loosened tolerance vs. the f32 reference.
    assert jnp.allclose(out, ref, atol=2e-2, rtol=2e-2), f"mismatch (max err {max_err})"

    # TODO(synk): training-mode Dropout and batch-statistics BatchNorm are not
    # implemented (eval-mode semantics only, matching .eval() inference).
    print("KERNEL_OK")
</pallas_src>

<mosaic_0001>
module attributes {stable_mosaic.version = 11 : i64} {
  func.func @_acnh_fused_kernel(%arg0: i32, %arg1: memref<128x3xi32, #tpu.memory_space<vmem>>, %arg2: memref<128x128xbf16, #tpu.memory_space<vmem>>, %arg3: memref<128x128xbf16, #tpu.memory_space<vmem>>, %arg4: memref<128x128xbf16, #tpu.memory_space<vmem>>, %arg5: memref<3x128xf32, #tpu.memory_space<vmem>>, %arg6: memref<128x128xf32, #tpu.memory_space<vmem>>) attributes {dimension_semantics = [#tpu.dimension_semantics<parallel>], iteration_bounds = array<i64: 1>, scalar_prefetch = 0 : i64, scratch_operands = 0 : i64, tpu.core_type = #tpu.core_type<tc>, window_params = [{transform_indices = @transform_0, window_bounds = array<i64: 128, 3>}, {pipeline_mode = #tpu.pipeline_mode<synchronous>, transform_indices = @transform_1, window_bounds = array<i64: 128, 128>}, {pipeline_mode = #tpu.pipeline_mode<synchronous>, transform_indices = @transform_2, window_bounds = array<i64: 128, 128>}, {pipeline_mode = #tpu.pipeline_mode<synchronous>, transform_indices = @transform_3, window_bounds = array<i64: 128, 128>}, {pipeline_mode = #tpu.pipeline_mode<synchronous>, transform_indices = @transform_4, window_bounds = array<i64: 3, 128>}, {transform_indices = @transform_5, window_bounds = array<i64: 128, 128>}]} {
    %c0 = arith.constant 0 : index
    %c0_0 = arith.constant 0 : index
    %0 = vector.load %arg1[%c0, %c0_0] : memref<128x3xi32, #tpu.memory_space<vmem>>, vector<128x3xi32>
    %1 = tpu.iota {dimensions = array<i32: 1>} : vector<128x128xi32>
    %cst = arith.constant 0.000000e+00 : f32
    %2 = vector.broadcast %cst : f32 to vector<128x128xf32>
    %3 = vector.extract_strided_slice %0 {offsets = [0, 0], sizes = [128, 1], strides = [1, 1]} : vector<128x3xi32> to vector<128x1xi32>
    %c0_i32 = arith.constant 0 : i32
    %4 = vector.broadcast %c0_i32 : i32 to vector<128x1xi32>
    %5 = arith.addi %3, %4 : vector<128x1xi32>
    %6 = vector.broadcast %5 : vector<128x1xi32> to vector<128x128xi32>
    %7 = arith.cmpi eq, %1, %6 : vector<128x128xi32>
    %8 = arith.extui %7 : vector<128x128xi1> to vector<128x128xi32>
    %9 = arith.sitofp %8 : vector<128x128xi32> to vector<128x128xf32>
    %10 = arith.addf %2, %9 : vector<128x128xf32>
    %11 = vector.extract_strided_slice %0 {offsets = [0, 1], sizes = [128, 1], strides = [1, 1]} : vector<128x3xi32> to vector<128x1xi32>
    %c10_i32 = arith.constant 10 : i32
    %12 = vector.broadcast %c10_i32 : i32 to vector<128x1xi32>
    %13 = arith.addi %11, %12 : vector<128x1xi32>
    %14 = vector.broadcast %13 : vector<128x1xi32> to vector<128x128xi32>
    %15 = arith.cmpi eq, %1, %14 : vector<128x128xi32>
    %16 = arith.extui %15 : vector<128x128xi1> to vector<128x128xi32>
    %17 = arith.sitofp %16 : vector<128x128xi32> to vector<128x128xf32>
    %18 = arith.addf %10, %17 : vector<128x128xf32>
    %19 = vector.extract_strided_slice %0 {offsets = [0, 2], sizes = [128, 1], strides = [1, 1]} : vector<128x3xi32> to vector<128x1xi32>
    %c18_i32 = arith.constant 18 : i32
    %20 = vector.broadcast %c18_i32 : i32 to vector<128x1xi32>
    %21 = arith.addi %19, %20 : vector<128x1xi32>
    %22 = vector.broadcast %21 : vector<128x1xi32> to vector<128x128xi32>
    %23 = arith.cmpi eq, %1, %22 : vector<128x128xi32>
    %24 = arith.extui %23 : vector<128x128xi1> to vector<128x128xi32>
    %25 = arith.sitofp %24 : vector<128x128xi32> to vector<128x128xf32>
    %26 = arith.addf %18, %25 : vector<128x128xf32>
    %c0_1 = arith.constant 0 : index
    %c0_2 = arith.constant 0 : index
    %27 = vector.load %arg5[%c0_1, %c0_2] : memref<3x128xf32, #tpu.memory_space<vmem>>, vector<3x128xf32>
    %28 = arith.truncf %26 : vector<128x128xf32> to vector<128x128xbf16>
    %c0_3 = arith.constant 0 : index
    %c0_4 = arith.constant 0 : index
    %29 = vector.load %arg2[%c0_3, %c0_4] : memref<128x128xbf16, #tpu.memory_space<vmem>>, vector<128x128xbf16>
    %cst_5 = arith.constant dense<0.000000e+00> : vector<128x128xf32>
    %30 = tpu.matmul %28, %29, %cst_5 {dimension_numbers = #tpu.dot_dimension_numbers<[1], [0], [0], [1], [0, 0, 1, 1], [], []>} : vector<128x128xbf16>, vector<128x128xbf16>, vector<128x128xf32> -> vector<128x128xf32>
    %31 = vector.extract_strided_slice %27 {offsets = [0, 0], sizes = [1, 128], strides = [1, 1]} : vector<3x128xf32> to vector<1x128xf32>
    %32 = vector.broadcast %31 : vector<1x128xf32> to vector<128x128xf32>
    %33 = arith.addf %30, %32 : vector<128x128xf32>
    %cst_6 = arith.constant 0.000000e+00 : f32
    %34 = vector.broadcast %cst_6 : f32 to vector<128x128xf32>
    %35 = arith.maximumf %33, %34 : vector<128x128xf32>
    %36 = arith.truncf %35 : vector<128x128xf32> to vector<128x128xbf16>
    %c0_7 = arith.constant 0 : index
    %c0_8 = arith.constant 0 : index
    %37 = vector.load %arg3[%c0_7, %c0_8] : memref<128x128xbf16, #tpu.memory_space<vmem>>, vector<128x128xbf16>
    %cst_9 = arith.constant dense<0.000000e+00> : vector<128x128xf32>
    %38 = tpu.matmul %36, %37, %cst_9 {dimension_numbers = #tpu.dot_dimension_numbers<[1], [0], [0], [1], [0, 0, 1, 1], [], []>} : vector<128x128xbf16>, vector<128x128xbf16>, vector<128x128xf32> -> vector<128x128xf32>
    %39 = vector.extract_strided_slice %27 {offsets = [1, 0], sizes = [1, 128], strides = [1, 1]} : vector<3x128xf32> to vector<1x128xf32>
    %40 = vector.broadcast %39 : vector<1x128xf32> to vector<128x128xf32>
    %41 = arith.addf %38, %40 : vector<128x128xf32>
    %cst_10 = arith.constant 0.000000e+00 : f32
    %42 = vector.broadcast %cst_10 : f32 to vector<128x128xf32>
    %43 = arith.maximumf %41, %42 : vector<128x128xf32>
    %44 = arith.truncf %43 : vector<128x128xf32> to vector<128x128xbf16>
    %c0_11 = arith.constant 0 : index
    %c0_12 = arith.constant 0 : index
    %45 = vector.load %arg4[%c0_11, %c0_12] : memref<128x128xbf16, #tpu.memory_space<vmem>>, vector<128x128xbf16>
    %cst_13 = arith.constant dense<0.000000e+00> : vector<128x128xf32>
    %46 = tpu.matmul %44, %45, %cst_13 {dimension_numbers = #tpu.dot_dimension_numbers<[1], [0], [0], [1], [0, 0, 1, 1], [], []>} : vector<128x128xbf16>, vector<128x128xbf16>, vector<128x128xf32> -> vector<128x128xf32>
    %47 = vector.extract_strided_slice %27 {offsets = [2, 0], sizes = [1, 128], strides = [1, 1]} : vector<3x128xf32> to vector<1x128xf32>
    %48 = vector.broadcast %47 : vector<1x128xf32> to vector<128x128xf32>
    %49 = arith.addf %46, %48 : vector<128x128xf32>
    %c0_14 = arith.constant 0 : index
    %c0_15 = arith.constant 0 : index
    %50 = vector.load %arg6[%c0_14, %c0_15] : memref<128x128xf32, #tpu.memory_space<vmem>>, vector<128x128xf32>
    tpu.vector_store %arg6[%c0_14, %c0_15], %49 {strides = array<i32>} : memref<128x128xf32, #tpu.memory_space<vmem>>, vector<128x128xf32>,
    return
  }
  func.func @transform_0(%arg0: i32) -> (i32, i32) {
    %c0_i32 = arith.constant 0 : i32
    %c0_i32_0 = arith.constant 0 : i32
    return %arg0, %c0_i32 : i32, i32
  }
  func.func @transform_1(%arg0: i32) -> (i32, i32) {
    %c0_i32 = arith.constant 0 : i32
    %c0_i32_0 = arith.constant 0 : i32
    %c0_i32_1 = arith.constant 0 : i32
    return %c0_i32, %c0_i32_0 : i32, i32
  }
  func.func @transform_2(%arg0: i32) -> (i32, i32) {
    %c0_i32 = arith.constant 0 : i32
    %c0_i32_0 = arith.constant 0 : i32
    %c0_i32_1 = arith.constant 0 : i32
    return %c0_i32, %c0_i32_0 : i32, i32
  }
  func.func @transform_3(%arg0: i32) -> (i32, i32) {
    %c0_i32 = arith.constant 0 : i32
    %c0_i32_0 = arith.constant 0 : i32
    %c0_i32_1 = arith.constant 0 : i32
    return %c0_i32, %c0_i32_0 : i32, i32
  }
  func.func @transform_4(%arg0: i32) -> (i32, i32) {
    %c0_i32 = arith.constant 0 : i32
    %c0_i32_0 = arith.constant 0 : i32
    %c0_i32_1 = arith.constant 0 : i32
    return %c0_i32, %c0_i32_0 : i32, i32
  }
  func.func @transform_5(%arg0: i32) -> (i32, i32) {
    %c0_i32 = arith.constant 0 : i32
    %c0_i32_0 = arith.constant 0 : i32
    return %arg0, %c0_i32 : i32, i32
  }
}

</mosaic_0001>

<bundles_post_ra>
// kernel: tpu_custom_call.1
= control target key start
LH: loop header
LB: loop body
LE: loop exit
PB: predicated region body
PF: predicated region fallthrough
CT: control target
= control target key end

     0   :  { %10 = vsyncpa [#allocation3], 0  ;;  %s1479_s0 = inlined_call_operand.vmem [shape: s32[128,3], index: 0, kind: input, shape index: {}]   ;;  %s1480_s1 = inlined_call_operand.vmem [shape: bf16[128,128], index: 1, kind: input, shape index: {}]   ;;  %s1481_s2 = inlined_call_operand.vmem [shape: bf16[128,128], index: 2, kind: input, shape index: {}]   ;;  %s1482_s3 = inlined_call_operand.hbm [shape: bf16[128,128], index: 3, kind: input, shape index: {}]   ;;  %s1483_s4 = inlined_call_operand.vmem [shape: f32[3,128], index: 4, kind: input, shape index: {}]   ;;  %s1484_s5 = inlined_call_operand.hbm [shape: f32[128,128], index: 5, kind: output, shape index: {}]  }
   0x1   :  { %11 = vsyncpa [#allocation4], 0  ;;  %s22_s20 = sshll.u32 %s1482_s3, 4  ;;  %s1150_s21 = smov [#allocation2]   ;;  %s23_s20 = int_to_ptr.hbm [resolvable:$true] %s22_s20 }
   0x2   :  { %s24_s22 = sshll.u32 %s1150_s21, 4  ;;  %s1151_s23 = smov 64   ;;  %s25_s22 = int_to_ptr.vmem [resolvable:$true] %s24_s22 }
   0x3   :  { %s1152_s24 = smov 4  }
   0x4   :  { %30 = dma.hbm_to_vmem [thread:$0]  %s23_s20, 1024, %s25_s22, [#allocation3], %s1151_s23, %s1151_s23, %s1152_s24  }
   0x5   :  { %1146 = dma.done.wait [#allocation3], 1024  }
   0x6   :  { %1147 = vsyncadd [#allocation3], 4294966272  ;;  %v1153_v0 = vmov 0   ;;  %v1154_v1 = vmov 1   ;;  %v1155_v2 = vmov 2   ;;  %v37_v3 = vld [vmem:[%s1479_s0] sm:$0xff]  ;;  %v53_v54 = vlaneseq }
   0x7   :  { %1059 = vset.pattern.permute.xlu0 %v1153_v0  ;;  %1060 = vset.pattern.permute.xlu1 %v1154_v1  ;;  %v167_v4 = vadd.s32 10, %v37_v3  ;;  %v295_v5 = vadd.s32 18, %v37_v3  ;;  %v38_v6 = vld [vmem:[%s1479_s0 + $0x8] sm:$0xff]  ;;  %v40_v9 = vld [vmem:[%s1479_s0 + $0x18] sm:$0xff]  ;;  %v39_v11 = vld [vmem:[%s1479_s0 + $0x10] sm:$0xff]  ;;  %v1156_v60 = vmov 0.0  }
   0x8   :  { %1062 = vset.pattern.permute.xlu2 %v1155_v2  ;;  %56 = vperm.xlu0 %1059, %v37_v3   ;;  %v168_v7 = vadd.s32 10, %v38_v6  ;;  %v296_v8 = vadd.s32 18, %v38_v6  ;;  %v170_v10 = vadd.s32 10, %v40_v9  ;;  %v169_v12 = vadd.s32 10, %v39_v11  ;;  %v41_v13 = vld [vmem:[%s1479_s0 + $0x20] sm:$0xff]  ;;  %v42_v17 = vld [vmem:[%s1479_s0 + $0x28] sm:$0xff] }
   0x9   :  { %184 = vperm.xlu1 %1060, %v167_v4   ;;  %312 = vperm.xlu2 %1062, %v295_v5   ;;  %v171_v14 = vadd.s32 10, %v41_v13  ;;  %v297_v15 = vadd.s32 18, %v39_v11  ;;  %v298_v16 = vadd.s32 18, %v40_v9  ;;  %v300_v18 = vadd.s32 18, %v42_v17  ;;  %v43_v19 = vld [vmem:[%s1479_s0 + $0x30] sm:$0xff]  ;;  %v44_v23 = vld [vmem:[%s1479_s0 + $0x38] sm:$0xff] }
   0xa   :  { %v301_v20 = vadd.s32 18, %v43_v19  ;;  %v172_v21 = vadd.s32 10, %v42_v17  ;;  %v299_v22 = vadd.s32 18, %v41_v13  ;;  %v50_v24 = vld [vmem:[%s1479_s0 + $0x68] sm:$0xff]  ;;  %v173_v25 = vadd.s32 10, %v43_v19  ;;  %v45_v27 = vld [vmem:[%s1479_s0 + $0x40] sm:$0xff] }
   0xb   :  { %v174_v26 = vadd.s32 10, %v44_v23  ;;  %v1008_v28 = vld [vmem:[%s1480_s1 + $0x38] sm:$0xff]  ;;  %v302_v29 = vadd.s32 18, %v44_v23  ;;  %v46_v30 = vld [vmem:[%s1479_s0 + $0x48] sm:$0xff]  ;;  %v1007_v31 = vld [vmem:[%s1480_s1 + $0x30] sm:$0xff]  ;;  %v180_v36 = vadd.s32 10, %v50_v24 }
   0xc   :  { %497 = vmatpush.bf16.msra.mxu0 %v1008_v28  ;;  %1025 = vmatpush.bf16.msra.mxu3 %v1008_v28  ;;  %v49_v32 = vld [vmem:[%s1479_s0 + $0x60] sm:$0xff]  ;;  %v176_v33 = vadd.s32 10, %v46_v30  ;;  %v1006_v34 = vld [vmem:[%s1480_s1 + $0x28] sm:$0xff]  ;;  %v51_v38 = vld [vmem:[%s1479_s0 + $0x70] sm:$0xff]  ;;  %v308_v42 = vadd.s32 18, %v50_v24  ;;  %v175_v47 = vadd.s32 10, %v45_v27 }
   0xd   :  { %v179_v35 = vadd.s32 10, %v49_v32  ;;  %v1005_v37 = vld [vmem:[%s1480_s1 + $0x20] sm:$0xff]  ;;  %v1004_v39 = vld [vmem:[%s1480_s1 + $0x18] sm:$0xff]  ;;  %v181_v40 = vadd.s32 10, %v51_v38  ;;  %v307_v41 = vadd.s32 18, %v49_v32  ;;  %v1003_v43 = vld [vmem:[%s1480_s1 + $0x10] sm:$0xff] }
   0xe   :  { %v1002_v44 = vld [vmem:[%s1480_s1 + $0x8] sm:$0xff]  ;;  %v52_v45 = vld [vmem:[%s1479_s0 + $0x78] sm:$0xff]  ;;  %v1001_v48 = vld [vmem:[%s1480_s1] sm:$0xff]  ;;  %v303_v50 = vadd.s32 18, %v45_v27  ;;  %v304_v51 = vadd.s32 18, %v46_v30  ;;  %v1292_v57 = vand.u32 127, %v53_v54 }
   0xf   :  { %v310_v46 = vadd.s32 18, %v52_v45  ;;  %v47_v52 = vld [vmem:[%s1479_s0 + $0x50] sm:$0xff]  ;;  %v182_v3 = vadd.s32 10, %v52_v45  ;;  %v309_v4 = vadd.s32 18, %v51_v38  ;;  %s844_s13 = sshll.u32 %s1484_s5, 4  ;;  %s1158_s14 = smov 128   ;;  %s845_s13 = int_to_ptr.hbm [resolvable:$true] %s844_s13 }
  0x10   :  { %59 = vperm.xlu0 %1059, %v38_v6   ;;  %498 = vmatpush.bf16.msra.mxu0 %v1007_v31  ;;  %v305_v53 = vadd.s32 18, %v47_v52  ;;  %s1159_s15 = smov 8  }
  0x11   :  { %187 = vperm.xlu1 %1060, %v168_v7   ;;  %315 = vperm.xlu2 %1062, %v296_v8  }
  0x12   :  { %1026 = vmatpush.bf16.msra.mxu3 %v1007_v31 }
  0x14   :  { %499 = vmatpush.bf16.msra.mxu0 %v1006_v34 }
  0x16   :  { %1027 = vmatpush.bf16.msra.mxu3 %v1006_v34 }
  0x18   :  { %1064 = vset.pattern.permute.xlu0 %v1154_v1  ;;  %500 = vmatpush.bf16.msra.mxu0 %v1005_v37 }
  0x19   :  { %193 = vperm.xlu0 %1064, %v170_v10   ;;  %1061 = vset.pattern.permute.xlu1 %v1153_v0 }
  0x1a   :  { %1063 = vset.pattern.permute.xlu2 %v1154_v1  ;;  %65 = vperm.xlu1 %1061, %v40_v9  }
  0x1b   :  { %190 = vperm.xlu2 %1063, %v169_v12   ;;  %1028 = vmatpush.bf16.msra.mxu3 %v1005_v37 }
  0x1c   :  { %501 = vmatpush.bf16.msra.mxu0 %v1004_v39 }
  0x1f   :  { %1029 = vmatpush.bf16.msra.mxu3 %v1004_v39 }
  0x20   :  { %502 = vmatpush.bf16.msra.mxu0 %v1003_v43 }
  0x21   :  { %196 = vperm.xlu0 %1064, %v171_v14  }
  0x22   :  { %1065 = vset.pattern.permute.xlu1 %v1155_v2 }
  0x23   :  { %1066 = vset.pattern.permute.xlu2 %v1155_v2  ;;  %318 = vperm.xlu1 %1065, %v297_v15  }
  0x24   :  { %321 = vperm.xlu2 %1066, %v298_v16   ;;  %1030 = vmatpush.bf16.msra.mxu3 %v1003_v43 }
  0x25   :  { %503 = vmatpush.bf16.msra.mxu0 %v1002_v44 }
  0x28   :  { %1031 = vmatpush.bf16.msra.mxu3 %v1002_v44 }
  0x29   :  { %1071 = vset.pattern.permute.xlu0 %v1155_v2  ;;  %504 = vmatpush.bf16.msra.mxu0 %v1001_v48 }
  0x2a   :  { %327 = vperm.xlu0 %1071, %v300_v18   ;;  %v48_v18 = vld [vmem:[%s1479_s0 + $0x58] sm:$0xff] }
  0x2b   :  { %1067 = vset.pattern.permute.xlu1 %v1153_v0 }
  0x2c   :  { %1068 = vset.pattern.permute.xlu2 %v1153_v0  ;;  %68 = vperm.xlu1 %1067, %v41_v13  }
  0x2d   :  { %71 = vperm.xlu2 %1068, %v42_v17   ;;  %1032 = vmatpush.bf16.msra.mxu3 %v1001_v48 }
  0x32   :  { %330 = vperm.xlu0 %1071, %v301_v20  }
  0x34   :  { %1069 = vset.pattern.permute.xlu1 %v1154_v1 }
  0x35   :  { %1070 = vset.pattern.permute.xlu2 %v1155_v2  ;;  %199 = vperm.xlu1 %1069, %v172_v21   ;;  %v177_v21 = vadd.s32 10, %v47_v52 }
  0x36   :  { %324 = vperm.xlu2 %1070, %v299_v22   ;;  %v178_v22 = vadd.s32 10, %v48_v18 }
  0x3a   :  { %1076 = vset.pattern.permute.xlu0 %v1153_v0 }
  0x3b   :  { %62 = vperm.xlu0 %1076, %v39_v11  }
  0x3d   :  { %1072 = vset.pattern.permute.xlu1 %v1153_v0 }
  0x3e   :  { %1073 = vset.pattern.permute.xlu2 %v1153_v0  ;;  %74 = vperm.xlu1 %1072, %v43_v19  }
  0x3f   :  { %77 = vperm.xlu2 %1073, %v44_v23  }
  0x43   :  { %95 = vperm.xlu0 %1076, %v50_v24  }
  0x46   :  { %1074 = vset.pattern.permute.xlu1 %v1154_v1 }
  0x47   :  { %1075 = vset.pattern.permute.xlu2 %v1154_v1  ;;  %202 = vperm.xlu1 %1074, %v173_v25  }
  0x48   :  { %205 = vperm.xlu2 %1075, %v174_v26   ;;  %v306_v26 = vadd.s32 18, %v48_v18 }
  0x4b   :  { %80 = vperm.xlu0 %1076, %v45_v27  }
  0x4f   :  { %1077 = vset.pattern.permute.xlu1 %v1155_v2 }
  0x50   :  { %1078 = vset.pattern.permute.xlu2 %v1153_v0  ;;  %333 = vperm.xlu1 %1077, %v302_v29  }
  0x51   :  { %92 = vperm.xlu2 %1078, %v49_v32  }
  0x53   :  { %1085 = vset.pattern.permute.xlu0 %v1154_v1 }
  0x54   :  { %211 = vperm.xlu0 %1085, %v176_v33  }
  0x58   :  { %1079 = vset.pattern.permute.xlu1 %v1154_v1 }
  0x59   :  { %1080 = vset.pattern.permute.xlu2 %v1154_v1  ;;  %220 = vperm.xlu1 %1079, %v179_v35  }
  0x5a   :  { %223 = vperm.xlu2 %1080, %v180_v36  }
  0x5c   :  { %226 = vperm.xlu0 %1085, %v181_v40  }
  0x61   :  { %1081 = vset.pattern.permute.xlu1 %v1155_v2 }
  0x62   :  { %1082 = vset.pattern.permute.xlu2 %v1155_v2  ;;  %348 = vperm.xlu1 %1081, %v307_v41  }
  0x63   :  { %351 = vperm.xlu2 %1082, %v308_v42   ;;  %v313_v49 = vpop.permute.xlu2 %312 }
  0x64   :  { %1092 = vset.pattern.permute.xlu0 %v1155_v2  ;;  %vm359_vm2 = vcmp.eq.s32.totalorder %v1292_v57, %v313_v49 }
  0x65   :  { %357 = vperm.xlu0 %1092, %v310_v46   ;;  %v889_v8 = vsel %vm359_vm2, 1.0, %v1156_v60 }
  0x6a   :  { %1083 = vset.pattern.permute.xlu1 %v1153_v0 }
  0x6b   :  { %1084 = vset.pattern.permute.xlu2 %v1154_v1  ;;  %83 = vperm.xlu1 %1083, %v46_v30   ;;  %v316_v55 = vpop.permute.xlu2 %315 }
  0x6c   :  { %208 = vperm.xlu2 %1084, %v175_v47   ;;  %vm360_vm4 = vcmp.eq.s32.totalorder %v1292_v57, %v316_v55 }
  0x6d   :  { %342 = vperm.xlu0 %1092, %v305_v53   ;;  %v890_v11 = vsel %vm360_vm4, 1.0, %v1156_v60 }
  0x73   :  { %1086 = vset.pattern.permute.xlu1 %v1155_v2 }
  0x74   :  { %1087 = vset.pattern.permute.xlu2 %v1155_v2  ;;  %336 = vperm.xlu1 %1086, %v303_v50  }
  0x75   :  { %339 = vperm.xlu2 %1087, %v304_v51   ;;  %v1298_v59 = vpop.permute.xlu2 %190 }
  0x76   :  { %vm233_vm8 = vcmp.eq.s32.totalorder %v1292_v57, %v1298_v59 }
  0x77   :  { %v875_v32 = vsel %vm233_vm8, 1.0, %v1156_v60 }
  0x7a   :  { %v57_v56 = vpop.permute.xlu0 %56 }
  0x7b   :  { %v185_v58 = vpop.permute.xlu1 %184  ;;  %vm103_vm0 = vcmp.eq.s32.totalorder %v1292_v57, %v57_v56 }
  0x7c   :  { %1088 = vset.pattern.permute.xlu1 %v1153_v0  ;;  %vm231_vm1 = vcmp.eq.s32.totalorder %v1292_v57, %v185_v58  ;;  %v857_v61 = vsel %vm103_vm0, 1.0, %v1156_v60 }
  0x7d   :  { %1089 = vset.pattern.permute.xlu2 %v1153_v0  ;;  %98 = vperm.xlu1 %1088, %v51_v38   ;;  %v873_v62 = vsel %vm231_vm1, 1.0, %v1156_v60 }
  0x7e   :  { %101 = vperm.xlu2 %1089, %v52_v45   ;;  %v279_v7 = vadd.f32 %v873_v62, %v857_v61  ;;  %v322_v16 = vpop.permute.xlu2 %321 }
  0x7f   :  { %vm362_vm9 = vcmp.eq.s32.totalorder %v1292_v57, %v322_v16 }
  0x80   :  { %v407_v12 = vadd.f32 %v889_v8, %v279_v7  ;;  %v892_v33 = vsel %vm362_vm9, 1.0, %v1156_v60 }
  0x82   :  { %v60_v63 = vpop.permute.xlu0 %59 }
  0x83   :  { %vm104_vm3 = vcmp.eq.s32.totalorder %v1292_v57, %v60_v63  ;;  %v188_v6 = vpop.permute.xlu1 %187 }
  0x84   :  { %v858_v5 = vsel %vm104_vm3, 1.0, %v1156_v60  ;;  %vm232_vm5 = vcmp.eq.s32.totalorder %v1292_v57, %v188_v6 }
  0x85   :  { %v874_v9 = vsel %vm232_vm5, 1.0, %v1156_v60  ;;  %1090 = vset.pattern.permute.xlu1 %v1154_v1 }
  0x86   :  { %1091 = vset.pattern.permute.xlu2 %v1155_v2  ;;  %v280_v10 = vadd.f32 %v874_v9, %v858_v5  ;;  %229 = vperm.xlu1 %1090, %v182_v3  }
  0x87   :  { %354 = vperm.xlu2 %1091, %v309_v4   ;;  %v72_v20 = vpop.permute.xlu2 %71 }
  0x88   :  { %v408_v13 = vadd.f32 %v890_v11, %v280_v10  ;;  %vm108_vm14 = vcmp.eq.s32.totalorder %v1292_v57, %v72_v20 }
  0x89   :  { %v862_v45 = vsel %vm108_vm14, 1.0, %v1156_v60 }
  0x8a   :  { %v424_v15 = vpack.c.bf16 %v408_v13, %v407_v12 }
  0x8b   :  { %v194_v14 = vpop.permute.xlu0 %193 }
  0x8c   :  { %505 = vmatmul.bf16.vlgmr.msra.gmra.mxu0 %v424_v15  ;;  %v66_v17 = vpop.permute.xlu1 %65  ;;  %vm234_vm6 = vcmp.eq.s32.totalorder %v1292_v57, %v194_v14 }
  0x8d   :  { %vm106_vm7 = vcmp.eq.s32.totalorder %v1292_v57, %v66_v17  ;;  %v876_v30 = vsel %vm234_vm6, 1.0, %v1156_v60 }
  0x8e   :  { %1093 = vset.pattern.permute.xlu1 %v1153_v0 }
  0x8f   :  { %1094 = vset.pattern.permute.xlu2 %v1153_v0  ;;  %86 = vperm.xlu1 %1093, %v47_v52  }
  0x90   :  { %89 = vperm.xlu2 %1094, %v48_v18   ;;  %v325_v25 = vpop.permute.xlu2 %324 }
  0x91   :  { %vm363_vm1 = vcmp.eq.s32.totalorder %v1292_v57, %v325_v25 }
  0x92   :  { %v893_v51 = vsel %vm363_vm1, 1.0, %v1156_v60 }
  0x93   :  { %v197_v19 = vpop.permute.xlu0 %196 }
  0x94   :  { %vm235_vm13 = vcmp.eq.s32.totalorder %v1292_v57, %v197_v19 }
  0x95   :  { %v319_v23 = vpop.permute.xlu1 %318  ;;  %v877_v44 = vsel %vm235_vm13, 1.0, %v1156_v60 }
  0x96   :  { %vm361_vm10 = vcmp.eq.s32.totalorder %v1292_v57, %v319_v23 }
  0x97   :  { %1095 = vset.pattern.permute.xlu1 %v1154_v1  ;;  %v891_v36 = vsel %vm361_vm10, 1.0, %v1156_v60 }
  0x98   :  { %1096 = vset.pattern.permute.xlu2 %v1154_v1  ;;  %214 = vperm.xlu1 %1095, %v177_v21   ;;  %v860_v1 = vsel %vm106_vm7, 1.0, %v1156_v60 }
  0x99   :  { %217 = vperm.xlu2 %1096, %v178_v22   ;;  %v78_v28 = vpop.permute.xlu2 %77 }
  0x9a   :  { %vm110_vm2 = vcmp.eq.s32.totalorder %v1292_v57, %v78_v28 }
  0x9b   :  { %v864_v58 = vsel %vm110_vm2, 1.0, %v1156_v60 }
  0x9c   :  { %v328_v24 = vpop.permute.xlu0 %327 }
  0x9d   :  { %vm364_vm0 = vcmp.eq.s32.totalorder %v1292_v57, %v328_v24  ;;  %v1016_v24 = vld [vmem:[%s1481_s2 + $0x38] sm:$0xff] }
  0x9e   :  { %v69_v27 = vpop.permute.xlu1 %68  ;;  %v894_v49 = vsel %vm364_vm0, 1.0, %v1156_v60  ;;  %635 = vmatpush.bf16.msra.mxu1 %v1016_v24  ;;  %1033 = vmatpush.bf16.msrb.mxu3 %v1016_v24 }
  0x9f   :  { %vm107_vm15 = vcmp.eq.s32.totalorder %v1292_v57, %v69_v27  ;;  %v1015_v27 = vld [vmem:[%s1481_s2 + $0x30] sm:$0xff] }
  0xa0   :  { %1097 = vset.pattern.permute.xlu1 %v1155_v2  ;;  %v282_v2 = vadd.f32 %v876_v30, %v860_v1  ;;  %v861_v46 = vsel %vm107_vm15, 1.0, %v1156_v60 }
  0xa1   :  { %345 = vperm.xlu1 %1097, %v306_v26   ;;  %v283_v50 = vadd.f32 %v877_v44, %v861_v46  ;;  %v1011_v44 = vld [vmem:[%s1481_s2 + $0x10] sm:$0xff] }
  0xa2   :  { %v206_v38 = vpop.permute.xlu2 %205  ;;  %v410_v39 = vadd.f32 %v892_v33, %v282_v2  ;;  %636 = vmatpush.bf16.msra.mxu1 %v1015_v27  ;;  %1034 = vmatpush.bf16.msrb.mxu3 %v1015_v27  ;;  %v1013_v2 = vld [vmem:[%s1481_s2 + $0x20] sm:$0xff] }
  0xa3   :  { %v411_v53 = vadd.f32 %v893_v51, %v283_v50  ;;  %vm238_vm3 = vcmp.eq.s32.totalorder %v1292_v57, %v206_v38  ;;  %v1012_v38 = vld [vmem:[%s1481_s2 + $0x18] sm:$0xff] }
  0xa4   :  { %v1320_v0 = vpop.permute.xlu0 %330  ;;  %v880_v59 = vsel %vm238_vm3, 1.0, %v1156_v60 }
  0xa5   :  { %vm365_vm7 = vcmp.eq.s32.totalorder %v1292_v57, %v1320_v0  ;;  %v286_v5 = vadd.f32 %v880_v59, %v864_v58 }
  0xa6   :  { %v895_v7 = vsel %vm365_vm7, 1.0, %v1156_v60 }
  0xa7   :  { %v200_v29 = vpop.permute.xlu1 %199 }
  0xa8   :  { %vm236_vm12 = vcmp.eq.s32.totalorder %v1292_v57, %v200_v29  ;;  %v1014_v29 = vld [vmem:[%s1481_s2 + $0x28] sm:$0xff] }
  0xa9   :  { %v878_v42 = vsel %vm236_vm12, 1.0, %v1156_v60  ;;  %637 = vmatpush.bf16.msra.mxu1 %v1014_v29  ;;  %1035 = vmatpush.bf16.msrb.mxu3 %v1014_v29 }
  0xaa   :  { %v284_v48 = vadd.f32 %v878_v42, %v862_v45 }
  0xab   :  { %v93_v47 = vpop.permute.xlu2 %92 }
  0xac   :  { %v412_v52 = vadd.f32 %v894_v49, %v284_v48  ;;  %vm115_vm12 = vcmp.eq.s32.totalorder %v1292_v57, %v93_v47  ;;  %v1010_v47 = vld [vmem:[%s1481_s2 + $0x8] sm:$0xff]  ;;  %v1009_v48 = vld [vmem:[%s1481_s2] sm:$0xff] }
  0xad   :  { %v63_v31 = vpop.permute.xlu0 %62  ;;  %v869_v17 = vsel %vm115_vm12, 1.0, %v1156_v60  ;;  %638 = vmatpush.bf16.msra.mxu1 %v1013_v2  ;;  %1036 = vmatpush.bf16.msrb.mxu3 %v1013_v2 }
  0xae   :  { %vm105_vm11 = vcmp.eq.s32.totalorder %v1292_v57, %v63_v31  ;;  %v426_v55 = vpack.c.bf16 %v412_v52, %v411_v53 }
  0xaf   :  { %v859_v34 = vsel %vm105_vm11, 1.0, %v1156_v60 }
  0xb0   :  { %v281_v35 = vadd.f32 %v875_v32, %v859_v34  ;;  %v75_v37 = vpop.permute.xlu1 %74 }
  0xb1   :  { %vm109_vm5 = vcmp.eq.s32.totalorder %v1292_v57, %v75_v37  ;;  %639 = vmatpush.bf16.msra.mxu1 %v1012_v38  ;;  %1037 = vmatpush.bf16.msrb.mxu3 %v1012_v38 }
  0xb2   :  { %v409_v40 = vadd.f32 %v891_v36, %v281_v35  ;;  %v863_v3 = vsel %vm109_vm5, 1.0, %v1156_v60 }
  0xb4   :  { %v425_v41 = vpack.c.bf16 %v410_v39, %v409_v40  ;;  %v224_v56 = vpop.permute.xlu2 %223 }
  0xb5   :  { %v96_v62 = vpop.permute.xlu0 %95  ;;  %vm244_vm8 = vcmp.eq.s32.totalorder %v1292_v57, %v224_v56  ;;  %640 = vmatpush.bf16.msra.mxu1 %v1011_v44  ;;  %1038 = vmatpush.bf16.msrb.mxu3 %v1011_v44 }
  0xb6   :  { %510 = vmatmul.bf16.gmra.mxu0 %v425_v41  ;;  %vm116_vm9 = vcmp.eq.s32.totalorder %v1292_v57, %v96_v62  ;;  %v886_v8 = vsel %vm244_vm8, 1.0, %v1156_v60 }
  0xb7   :  { %v870_v9 = vsel %vm116_vm9, 1.0, %v1156_v60 }
  0xb8   :  { %v292_v12 = vadd.f32 %v886_v8, %v870_v9 }
  0xb9   :  { %v203_v43 = vpop.permute.xlu1 %202  ;;  %641 = vmatpush.bf16.msra.mxu1 %v1010_v47  ;;  %1039 = vmatpush.bf16.msrb.mxu3 %v1010_v47  ;;  %v1024_v47 = vld [vmem:[#allocation2 + $0x38] sm:$0xff] }
  0xba   :  { %vm237_vm4 = vcmp.eq.s32.totalorder %v1292_v57, %v203_v43  ;;  %773 = vmatpush.bf16.msra.mxu2 %v1024_v47 }
  0xbb   :  { %v879_v61 = vsel %vm237_vm4, 1.0, %v1156_v60 }
  0xbc   :  { %v285_v6 = vadd.f32 %v879_v61, %v863_v3 }
  0xbd   :  { %v352_v10 = vpop.permute.xlu2 %351  ;;  %v81_v18 = vpop.permute.xlu0 %80  ;;  %642 = vmatpush.bf16.msra.mxu1 %v1009_v48  ;;  %1040 = vmatpush.bf16.msrb.mxu3 %v1009_v48 }
  0xbe   :  { %vm372_vm10 = vcmp.eq.s32.totalorder %v1292_v57, %v352_v10  ;;  %v413_v13 = vadd.f32 %v895_v7, %v285_v6  ;;  %vm111_vm0 = vcmp.eq.s32.totalorder %v1292_v57, %v81_v18  ;;  %v1423_v6 = vld [vmem:[%s1483_s4] sm:$0x7]  ;;  %s1157_s4 = smov [#allocation5]  }
  0xbf   :  { %v902_v14 = vsel %vm372_vm10, 1.0, %v1156_v60  ;;  %v865_v32 = vsel %vm111_vm0, 1.0, %v1156_v60  ;;  %v1426_v10 = vperm.slane %v1423_v6, 0  ;;  %s842_s10 = sshll.u32 %s1157_s4, 4  ;;  %s843_s10 = int_to_ptr.vmem [resolvable:$true] %s842_s10 }
  0xc0   :  { %v420_v20 = vadd.f32 %v902_v14, %v292_v12 }
  0xc2   :  { %v334_v54 = vpop.permute.xlu1 %333 }
  0xc3   :  { %vm366_vm6 = vcmp.eq.s32.totalorder %v1292_v57, %v334_v54 }
  0xc4   :  { %v896_v4 = vsel %vm366_vm6, 1.0, %v1156_v60 }
  0xc5   :  { %v414_v11 = vadd.f32 %v896_v4, %v286_v5 }
  0xc6   :  { %515 = vmatmul.bf16.gmra.mxu0 %v426_v55  ;;  %v209_v25 = vpop.permute.xlu2 %208  ;;  %v212_v0 = vpop.permute.xlu0 %211 }
  0xc7   :  { %v427_v16 = vpack.c.bf16 %v414_v11, %v413_v13  ;;  %vm240_vm14 = vcmp.eq.s32.totalorder %v1292_v57, %v212_v0  ;;  %vm239_vm1 = vcmp.eq.s32.totalorder %v1292_v57, %v209_v25 }
  0xc8   :  { %v882_v1 = vsel %vm240_vm14, 1.0, %v1156_v60  ;;  %v881_v33 = vsel %vm239_vm1, 1.0, %v1156_v60 }
  0xc9   :  { %v287_v37 = vadd.f32 %v881_v33, %v865_v32 }
  0xcb   :  { %v221_v63 = vpop.permute.xlu1 %220 }
  0xcc   :  { %vm243_vm11 = vcmp.eq.s32.totalorder %v1292_v57, %v221_v63 }
  0xcd   :  { %v885_v15 = vsel %vm243_vm11, 1.0, %v1156_v60 }
  0xce   :  { %v291_v21 = vadd.f32 %v885_v15, %v869_v17  ;;  %v227_v45 = vpop.permute.xlu0 %226 }
  0xcf   :  { %v340_v30 = vpop.permute.xlu2 %339  ;;  %vm245_vm4 = vcmp.eq.s32.totalorder %v1292_v57, %v227_v45 }
  0xd0   :  { %vm368_vm2 = vcmp.eq.s32.totalorder %v1292_v57, %v340_v30  ;;  %v887_v51 = vsel %vm245_vm4, 1.0, %v1156_v60 }
  0xd1   :  { %v898_v35 = vsel %vm368_vm2, 1.0, %v1156_v60 }
  0xd4   :  { %v349_v19 = vpop.permute.xlu1 %348 }
  0xd5   :  { %vm371_vm13 = vcmp.eq.s32.totalorder %v1292_v57, %v349_v19 }
  0xd6   :  { %520 = vmatmul.bf16.gmra.mxu0 %v427_v16  ;;  %v901_v22 = vsel %vm371_vm13, 1.0, %v1156_v60 }
  0xd7   :  { %v419_v23 = vadd.f32 %v901_v22, %v291_v21  ;;  %v358_v50 = vpop.permute.xlu0 %357 }
  0xd8   :  { %v102_v42 = vpop.permute.xlu2 %101  ;;  %vm374_vm8 = vcmp.eq.s32.totalorder %v1292_v57, %v358_v50 }
  0xd9   :  { %v430_v26 = vpack.c.bf16 %v420_v20, %v419_v23  ;;  %vm118_vm6 = vcmp.eq.s32.totalorder %v1292_v57, %v102_v42  ;;  %v904_v59 = vsel %vm374_vm8, 1.0, %v1156_v60 }
  0xda   :  { %v872_v55 = vsel %vm118_vm6, 1.0, %v1156_v60 }
  0xdb   :  { %535 = vmatmul.bf16.vlgmr.msra.gmra.mxu3 %v430_v26 }
  0xdc   :  { %1041 = vmatpush.bf16.msra.mxu3 %v1024_v47 }
  0xdd   :  { %v84_v28 = vpop.permute.xlu1 %83 }
  0xde   :  { %vm112_vm15 = vcmp.eq.s32.totalorder %v1292_v57, %v84_v28 }
  0xdf   :  { %v866_v31 = vsel %vm112_vm15, 1.0, %v1156_v60  ;;  %v343_v11 = vpop.permute.xlu0 %342 }
  0xe0   :  { %v288_v34 = vadd.f32 %v882_v1, %v866_v31  ;;  %vm369_vm14 = vcmp.eq.s32.totalorder %v1292_v57, %v343_v11 }
  0xe1   :  { %v355_v49 = vpop.permute.xlu2 %354  ;;  %v899_v24 = vsel %vm369_vm14, 1.0, %v1156_v60 }
  0xe2   :  { %v416_v40 = vadd.f32 %v898_v35, %v288_v34  ;;  %vm373_vm7 = vcmp.eq.s32.totalorder %v1292_v57, %v355_v49 }
  0xe3   :  { %v903_v56 = vsel %vm373_vm7, 1.0, %v1156_v60 }
  0xe6   :  { %v337_v36 = vpop.permute.xlu1 %336 }
  0xe7   :  { %vm367_vm3 = vcmp.eq.s32.totalorder %v1292_v57, %v337_v36 }
  0xe8   :  { %v897_v39 = vsel %vm367_vm3, 1.0, %v1156_v60 }
  0xe9   :  { %v415_v41 = vadd.f32 %v897_v39, %v287_v37 }
  0xea   :  { %v90_v4 = vpop.permute.xlu2 %89 }
  0xeb   :  { %v428_v43 = vpack.c.bf16 %v416_v40, %v415_v41  ;;  %vm114_vm11 = vcmp.eq.s32.totalorder %v1292_v57, %v90_v4 }
  0xec   :  { %v868_v14 = vsel %vm114_vm11, 1.0, %v1156_v60 }
  0xed   :  { %525 = vmatmul.bf16.gmra.mxu0 %v428_v43 }
  0xef   :  { %v99_v46 = vpop.permute.xlu1 %98 }
  0xf0   :  { %vm117_vm5 = vcmp.eq.s32.totalorder %v1292_v57, %v99_v46 }
  0xf1   :  { %v871_v52 = vsel %vm117_vm5, 1.0, %v1156_v60 }
  0xf2   :  { %v293_v54 = vadd.f32 %v887_v51, %v871_v52  ;;  %v1023_v51 = vld [vmem:[#allocation2 + $0x30] sm:$0xff] }
  0xf3   :  { %v218_v9 = vpop.permute.xlu2 %217  ;;  %774 = vmatpush.bf16.msra.mxu2 %v1023_v51  ;;  %1042 = vmatpush.bf16.msra.mxu3 %v1023_v51 }
  0xf4   :  { %v421_v62 = vadd.f32 %v903_v56, %v293_v54  ;;  %vm242_vm13 = vcmp.eq.s32.totalorder %v1292_v57, %v218_v9  ;;  %v1022_v56 = vld [vmem:[#allocation2 + $0x28] sm:$0xff]  ;;  %v1017_v9 = vld [vmem:[#allocation2] sm:$0xff] }
  0xf5   :  { %v884_v16 = vsel %vm242_vm13, 1.0, %v1156_v60 }
  0xf6   :  { %v290_v21 = vadd.f32 %v884_v16, %v868_v14 }
  0xf7   :  { %775 = vmatpush.bf16.msra.mxu2 %v1022_v56  ;;  %1043 = vmatpush.bf16.msra.mxu3 %v1022_v56 }
  0xf8   :  { %v230_v53 = vpop.permute.xlu1 %229 }
  0xf9   :  { %vm246_vm9 = vcmp.eq.s32.totalorder %v1292_v57, %v230_v53 }
  0xfa   :  { %v888_v58 = vsel %vm246_vm9, 1.0, %v1156_v60 }
  0xfb   :  { %v294_v61 = vadd.f32 %v888_v58, %v872_v55  ;;  %v1021_v58 = vld [vmem:[#allocation2 + $0x20] sm:$0xff] }
  0xfc   :  { %776 = vmatpush.bf16.msra.mxu2 %v1021_v58  ;;  %1044 = vmatpush.bf16.msra.mxu3 %v1021_v58 }
  0xfd   :  { %v422_v63 = vadd.f32 %v904_v59, %v294_v61 }
  0xff   :  { %v431_v3 = vpack.c.bf16 %v422_v63, %v421_v62  ;;  %v1020_v63 = vld [vmem:[#allocation2 + $0x18] sm:$0xff] }
 0x100   :  { %777 = vmatpush.bf16.msra.mxu2 %v1020_v63  ;;  %1045 = vmatpush.bf16.msra.mxu3 %v1020_v63 }
 0x101   :  { %540 = vmatmul.bf16.gmra.mxu3 %v431_v3  ;;  %v87_v5 = vpop.permute.xlu1 %86 }
 0x102   :  { %vm113_vm12 = vcmp.eq.s32.totalorder %v1292_v57, %v87_v5 }
 0x103   :  { %v867_v15 = vsel %vm113_vm12, 1.0, %v1156_v60 }
 0x109   :  { %v506_v7 = vpop.f32.mrf.mxu0 }
 0x10a   :  { %v215_v8 = vpop.permute.xlu1 %214  ;;  %v507_v13 = vadd.f32 %v506_v7, %v1426_v10  ;;  %v1019_v7 = vld [vmem:[#allocation2 + $0x10] sm:$0xff] }
 0x10b   :  { %vm241_vm10 = vcmp.eq.s32.totalorder %v1292_v57, %v215_v8  ;;  %778 = vmatpush.bf16.msra.mxu2 %v1019_v7  ;;  %1046 = vmatpush.bf16.msra.mxu3 %v1019_v7  ;;  %v1018_v8 = vld [vmem:[#allocation2 + $0x8] sm:$0xff] }
 0x10c   :  { %v883_v12 = vsel %vm241_vm10, 1.0, %v1156_v60  ;;  %v546_v22 = vmax.f32 %v507_v13, 0.0 }
 0x10d   :  { %v289_v18 = vadd.f32 %v883_v12, %v867_v15 }
 0x10f   :  { %v417_v0 = vadd.f32 %v899_v24, %v289_v18  ;;  %779 = vmatpush.bf16.msra.mxu2 %v1018_v8  ;;  %1047 = vmatpush.bf16.msra.mxu3 %v1018_v8 }
 0x111   :  { %v508_v17 = vpop.f32.mrf.mxu0 }
 0x112   :  { %v509_v19 = vadd.f32 %v508_v17, %v1426_v10 }
 0x113   :  { %v346_v20 = vpop.permute.xlu1 %345  ;;  %780 = vmatpush.bf16.msra.mxu2 %v1017_v9  ;;  %1048 = vmatpush.bf16.msra.mxu3 %v1017_v9 }
 0x114   :  { %v547_v23 = vmax.f32 %v509_v19, 0.0  ;;  %vm370_vm15 = vcmp.eq.s32.totalorder %v1292_v57, %v346_v20  ;;  %v1455_v20 = vperm.slane %v1423_v6, 1 }
 0x115   :  { %v900_v25 = vsel %vm370_vm15, 1.0, %v1156_v60 }
 0x116   :  { %v418_v26 = vadd.f32 %v900_v25, %v290_v21  ;;  %v562_v27 = vpack.c.bf16 %v547_v23, %v546_v22 }
 0x118   :  { %643 = vmatmul.bf16.vlgmr.msra.gmra.mxu1 %v562_v27  ;;  %v429_v28 = vpack.c.bf16 %v418_v26, %v417_v0 }
 0x11a   :  { %530 = vmatmul.bf16.gmra.mxu0 %v429_v28 }
 0x133   :  { %v511_v29 = vpop.f32.mrf.mxu0 }
 0x134   :  { %v512_v30 = vadd.f32 %v511_v29, %v1426_v10 }
 0x136   :  { %v548_v2 = vmax.f32 %v512_v30, 0.0 }
 0x13b   :  { %v513_v1 = vpop.f32.mrf.mxu0 }
 0x13c   :  { %v514_v31 = vadd.f32 %v513_v1, %v1426_v10 }
 0x13e   :  { %v549_v32 = vmax.f32 %v514_v31, 0.0 }
 0x140   :  { %v563_v33 = vpack.c.bf16 %v549_v32, %v548_v2 }
 0x142   :  { %648 = vmatmul.bf16.gmra.mxu1 %v563_v33 }
 0x143   :  { %v516_v57 = vpop.f32.mrf.mxu0 }
 0x144   :  { %v517_v34 = vadd.f32 %v516_v57, %v1426_v10 }
 0x146   :  { %v550_v36 = vmax.f32 %v517_v34, 0.0 }
 0x14b   :  { %v518_v60 = vpop.f32.mrf.mxu0 }
 0x14c   :  { %v519_v35 = vadd.f32 %v518_v60, %v1426_v10 }
 0x14e   :  { %v551_v37 = vmax.f32 %v519_v35, 0.0 }
 0x150   :  { %v564_v38 = vpack.c.bf16 %v551_v37, %v550_v36 }
 0x152   :  { %653 = vmatmul.bf16.gmra.mxu1 %v564_v38 }
 0x153   :  { %v521_v39 = vpop.f32.mrf.mxu0 }
 0x154   :  { %v522_v40 = vadd.f32 %v521_v39, %v1426_v10 }
 0x156   :  { %v552_v43 = vmax.f32 %v522_v40, 0.0 }
 0x15b   :  { %v523_v41 = vpop.f32.mrf.mxu0 }
 0x15c   :  { %v524_v42 = vadd.f32 %v523_v41, %v1426_v10 }
 0x15e   :  { %v553_v44 = vmax.f32 %v524_v42, 0.0  ;;  %v536_v45 = vpop.f32.mrf.mxu3 }
 0x15f   :  { %v537_v48 = vadd.f32 %v536_v45, %v1426_v10 }
 0x160   :  { %v565_v46 = vpack.c.bf16 %v553_v44, %v552_v43 }
 0x161   :  { %v558_v52 = vmax.f32 %v537_v48, 0.0 }
 0x162   :  { %658 = vmatmul.bf16.gmra.mxu1 %v565_v46 }
 0x166   :  { %v538_v49 = vpop.f32.mrf.mxu3 }
 0x167   :  { %v539_v50 = vadd.f32 %v538_v49, %v1426_v10 }
 0x169   :  { %v559_v53 = vmax.f32 %v539_v50, 0.0 }
 0x16a   :  { %v526_v54 = vpop.f32.mrf.mxu0 }
 0x16b   :  { %v568_v55 = vpack.c.bf16 %v559_v53, %v558_v52  ;;  %v527_v59 = vadd.f32 %v526_v54, %v1426_v10 }
 0x16d   :  { %673 = vmatmul.bf16.vlgmr.msrb.gmra.mxu3 %v568_v55  ;;  %v554_v3 = vmax.f32 %v527_v59, 0.0 }
 0x172   :  { %v528_v61 = vpop.f32.mrf.mxu0 }
 0x173   :  { %v529_v62 = vadd.f32 %v528_v61, %v1426_v10 }
 0x175   :  { %v555_v4 = vmax.f32 %v529_v62, 0.0 }
 0x177   :  { %v566_v5 = vpack.c.bf16 %v555_v4, %v554_v3 }
 0x179   :  { %663 = vmatmul.bf16.gmra.mxu1 %v566_v5 }
 0x184   :  { %v541_v11 = vpop.f32.mrf.mxu3 }
 0x185   :  { %v542_v12 = vadd.f32 %v541_v11, %v1426_v10 }
 0x187   :  { %v560_v15 = vmax.f32 %v542_v12, 0.0 }
 0x18c   :  { %v543_v13 = vpop.f32.mrf.mxu3 }
 0x18d   :  { %v544_v14 = vadd.f32 %v543_v13, %v1426_v10  ;;  %v724_v13 = vperm.slane %v1423_v6, 2 }
 0x18f   :  { %v561_v16 = vmax.f32 %v544_v14, 0.0 }
 0x191   :  { %v569_v17 = vpack.c.bf16 %v561_v16, %v560_v15 }
 0x193   :  { %678 = vmatmul.bf16.gmra.mxu3 %v569_v17 }
 0x195   :  { %v644_v18 = vpop.f32.mrf.mxu1 }
 0x196   :  { %v645_v21 = vadd.f32 %v644_v18, %v1455_v20 }
 0x197   :  { %v531_v19 = vpop.f32.mrf.mxu0 }
 0x198   :  { %v532_v23 = vadd.f32 %v531_v19, %v1426_v10  ;;  %v684_v26 = vmax.f32 %v645_v21, 0.0 }
 0x19a   :  { %v556_v28 = vmax.f32 %v532_v23, 0.0 }
 0x19d   :  { %v646_v22 = vpop.f32.mrf.mxu1 }
 0x19e   :  { %v647_v24 = vadd.f32 %v646_v22, %v1455_v20 }
 0x19f   :  { %v533_v25 = vpop.f32.mrf.mxu0 }
 0x1a0   :  { %v685_v27 = vmax.f32 %v647_v24, 0.0  ;;  %v534_v0 = vadd.f32 %v533_v25, %v1426_v10 }
 0x1a2   :  { %v557_v29 = vmax.f32 %v534_v0, 0.0  ;;  %v700_v30 = vpack.c.bf16 %v685_v27, %v684_v26 }
 0x1a4   :  { %781 = vmatmul.bf16.vlgmr.msra.gmra.mxu2 %v700_v30  ;;  %v567_v1 = vpack.c.bf16 %v557_v29, %v556_v28 }
 0x1a6   :  { %668 = vmatmul.bf16.gmra.mxu1 %v567_v1 }
 0x1bf   :  { %v649_v31 = vpop.f32.mrf.mxu1 }
 0x1c0   :  { %v650_v2 = vadd.f32 %v649_v31, %v1455_v20 }
 0x1c2   :  { %v686_v57 = vmax.f32 %v650_v2, 0.0 }
 0x1c7   :  { %v651_v32 = vpop.f32.mrf.mxu1 }
 0x1c8   :  { %v652_v33 = vadd.f32 %v651_v32, %v1455_v20 }
 0x1ca   :  { %v687_v34 = vmax.f32 %v652_v33, 0.0 }
 0x1cc   :  { %v701_v60 = vpack.c.bf16 %v687_v34, %v686_v57 }
 0x1ce   :  { %786 = vmatmul.bf16.gmra.mxu2 %v701_v60 }
 0x1cf   :  { %v654_v35 = vpop.f32.mrf.mxu1 }
 0x1d0   :  { %v655_v36 = vadd.f32 %v654_v35, %v1455_v20 }
 0x1d2   :  { %v688_v38 = vmax.f32 %v655_v36, 0.0 }
 0x1d7   :  { %v656_v10 = vpop.f32.mrf.mxu1 }
 0x1d8   :  { %v657_v37 = vadd.f32 %v656_v10, %v1455_v20 }
 0x1da   :  { %v689_v39 = vmax.f32 %v657_v37, 0.0 }
 0x1dc   :  { %v702_v40 = vpack.c.bf16 %v689_v39, %v688_v38 }
 0x1de   :  { %791 = vmatmul.bf16.gmra.mxu2 %v702_v40 }
 0x1df   :  { %v659_v41 = vpop.f32.mrf.mxu1 }
 0x1e0   :  { %v660_v42 = vadd.f32 %v659_v41, %v1455_v20 }
 0x1e2   :  { %v690_v45 = vmax.f32 %v660_v42, 0.0 }
 0x1e7   :  { %v661_v43 = vpop.f32.mrf.mxu1 }
 0x1e8   :  { %v662_v44 = vadd.f32 %v661_v43, %v1455_v20 }
 0x1ea   :  { %v691_v46 = vmax.f32 %v662_v44, 0.0 }
 0x1ec   :  { %v703_v47 = vpack.c.bf16 %v691_v46, %v690_v45 }
 0x1ee   :  { %796 = vmatmul.bf16.gmra.mxu2 %v703_v47 }
 0x1f0   :  { %v674_v48 = vpop.f32.mrf.mxu3 }
 0x1f1   :  { %v675_v50 = vadd.f32 %v674_v48, %v1455_v20 }
 0x1f3   :  { %v696_v53 = vmax.f32 %v675_v50, 0.0 }
 0x1f6   :  { %v664_v49 = vpop.f32.mrf.mxu1 }
 0x1f7   :  { %v665_v55 = vadd.f32 %v664_v49, %v1455_v20 }
 0x1f8   :  { %v676_v51 = vpop.f32.mrf.mxu3 }
 0x1f9   :  { %v677_v52 = vadd.f32 %v676_v51, %v1455_v20  ;;  %v692_v61 = vmax.f32 %v665_v55, 0.0 }
 0x1fb   :  { %v697_v54 = vmax.f32 %v677_v52, 0.0 }
 0x1fd   :  { %v706_v56 = vpack.c.bf16 %v697_v54, %v696_v53 }
 0x1fe   :  { %v666_v58 = vpop.f32.mrf.mxu1 }
 0x1ff   :  { %v667_v59 = vadd.f32 %v666_v58, %v1455_v20  ;;  %811 = vmatmul.bf16.vlgmr.msra.gmra.mxu3 %v706_v56 }
 0x201   :  { %v693_v62 = vmax.f32 %v667_v59, 0.0 }
 0x203   :  { %v704_v63 = vpack.c.bf16 %v693_v62, %v692_v61 }
 0x205   :  { %801 = vmatmul.bf16.gmra.mxu2 %v704_v63 }
 0x216   :  { %v679_v3 = vpop.f32.mrf.mxu3 }
 0x217   :  { %v680_v4 = vadd.f32 %v679_v3, %v1455_v20 }
 0x219   :  { %v698_v8 = vmax.f32 %v680_v4, 0.0 }
 0x21e   :  { %v681_v5 = vpop.f32.mrf.mxu3 }
 0x21f   :  { %v682_v7 = vadd.f32 %v681_v5, %v1455_v20 }
 0x221   :  { %v699_v9 = vmax.f32 %v682_v7, 0.0 }
 0x223   :  { %v669_v11 = vpop.f32.mrf.mxu1  ;;  %v707_v12 = vpack.c.bf16 %v699_v9, %v698_v8 }
 0x224   :  { %v670_v16 = vadd.f32 %v669_v11, %v1455_v20 }
 0x225   :  { %816 = vmatmul.bf16.gmra.mxu3 %v707_v12 }
 0x226   :  { %v694_v19 = vmax.f32 %v670_v16, 0.0 }
 0x227   :  { %v782_v14 = vpop.f32.mrf.mxu2 }
 0x228   :  { %v783_v15 = vadd.f32 %v782_v14, %v724_v13 }
 0x22a   :  { %822 = vst [vmem:[#allocation5] sm:$0xff] %v783_v15 }
 0x22b   :  { %v671_v17 = vpop.f32.mrf.mxu1 }
 0x22c   :  { %v672_v18 = vadd.f32 %v671_v17, %v1455_v20 }
 0x22e   :  { %v695_v21 = vmax.f32 %v672_v18, 0.0 }
 0x22f   :  { %v784_v22 = vpop.f32.mrf.mxu2 }
 0x230   :  { %v785_v23 = vadd.f32 %v784_v22, %v724_v13  ;;  %v705_v24 = vpack.c.bf16 %v695_v21, %v694_v19 }
 0x232   :  { %823 = vst [vmem:[#allocation5 + $0x8] sm:$0xff] %v785_v23  ;;  %806 = vmatmul.bf16.gmra.mxu2 %v705_v24 }
 0x251   :  { %v787_v25 = vpop.f32.mrf.mxu2 }
 0x252   :  { %v788_v26 = vadd.f32 %v787_v25, %v724_v13 }
 0x254   :  { %824 = vst [vmem:[#allocation5 + $0x10] sm:$0xff] %v788_v26 }
 0x259   :  { %v789_v6 = vpop.f32.mrf.mxu2 }
 0x25a   :  { %v790_v27 = vadd.f32 %v789_v6, %v724_v13 }
 0x25c   :  { %825 = vst [vmem:[#allocation5 + $0x18] sm:$0xff] %v790_v27 }
 0x261   :  { %v792_v0 = vpop.f32.mrf.mxu2 }
 0x262   :  { %v793_v28 = vadd.f32 %v792_v0, %v724_v13 }
 0x264   :  { %826 = vst [vmem:[#allocation5 + $0x20] sm:$0xff] %v793_v28 }
 0x269   :  { %v794_v29 = vpop.f32.mrf.mxu2 }
 0x26a   :  { %v795_v30 = vadd.f32 %v794_v29, %v724_v13 }
 0x26c   :  { %827 = vst [vmem:[#allocation5 + $0x28] sm:$0xff] %v795_v30 }
 0x271   :  { %v797_v20 = vpop.f32.mrf.mxu2 }
 0x272   :  { %v798_v1 = vadd.f32 %v797_v20, %v724_v13 }
 0x274   :  { %828 = vst [vmem:[#allocation5 + $0x30] sm:$0xff] %v798_v1 }
 0x279   :  { %v799_v31 = vpop.f32.mrf.mxu2 }
 0x27a   :  { %v800_v2 = vadd.f32 %v799_v31, %v724_v13 }
 0x27c   :  { %829 = vst [vmem:[#allocation5 + $0x38] sm:$0xff] %v800_v2 }
 0x282   :  { %v812_v32 = vpop.f32.mrf.mxu3 }
 0x283   :  { %v813_v33 = vadd.f32 %v812_v32, %v724_v13 }
 0x285   :  { %834 = vst [vmem:[#allocation5 + $0x60] sm:$0xff] %v813_v33 }
 0x288   :  { %v802_v57 = vpop.f32.mrf.mxu2 }
 0x289   :  { %v803_v34 = vadd.f32 %v802_v57, %v724_v13 }
 0x28a   :  { %v814_v60 = vpop.f32.mrf.mxu3 }
 0x28b   :  { %830 = vst [vmem:[#allocation5 + $0x40] sm:$0xff] %v803_v34  ;;  %v815_v35 = vadd.f32 %v814_v60, %v724_v13 }
 0x28d   :  { %835 = vst [vmem:[#allocation5 + $0x68] sm:$0xff] %v815_v35 }
 0x290   :  { %v804_v36 = vpop.f32.mrf.mxu2 }
 0x291   :  { %v805_v10 = vadd.f32 %v804_v36, %v724_v13 }
 0x293   :  { %831 = vst [vmem:[#allocation5 + $0x48] sm:$0xff] %v805_v10 }
 0x2a8   :  { %v817_v37 = vpop.f32.mrf.mxu3 }
 0x2a9   :  { %v818_v38 = vadd.f32 %v817_v37, %v724_v13 }
 0x2ab   :  { %836 = vst [vmem:[#allocation5 + $0x70] sm:$0xff] %v818_v38 }
 0x2b0   :  { %v819_v39 = vpop.f32.mrf.mxu3 }
 0x2b1   :  { %v820_v40 = vadd.f32 %v819_v39, %v724_v13 }
 0x2b3   :  { %837 = vst [vmem:[#allocation5 + $0x78] sm:$0xff] %v820_v40 }
 0x2b5   :  { %v807_v41 = vpop.f32.mrf.mxu2 }
 0x2b6   :  { %v808_v42 = vadd.f32 %v807_v41, %v724_v13 }
 0x2b8   :  { %832 = vst [vmem:[#allocation5 + $0x50] sm:$0xff] %v808_v42 }
 0x2bd   :  { %v809_v43 = vpop.f32.mrf.mxu2 }
 0x2be   :  { %v810_v44 = vadd.f32 %v809_v43, %v724_v13 }
 0x2c0   :  { %833 = vst [vmem:[#allocation5 + $0x58] sm:$0xff] %v810_v44 }
 0x2c1   :  { %850 = dma.vmem_to_hbm [thread:$0]  %s843_s10, 2048, %s845_s13, [#allocation4], %s1158_s14, %s1158_s14, %s1159_s15  }
 0x2c2   :  { %1148 = dma.done.wait [#allocation4], 2048  }
 0x2c3   :  { %1149 = vsyncadd [#allocation4], 4294965248 }
 0x2c4   :  { %855 = vsyncpa [#allocation3], 1 }
 0x2c5   :  { %856 = vsyncpa [#allocation4], 1 }

</bundles_post_ra>
